<compile_context>
chip_gen: v7x
topology: tpu7x:2x2x1
jax: 0.10.0
libtpu: 0.0.40
codegen_flags: <defaults>
</compile_context>

<pallas_src>
import functools

import jax
import jax.numpy as jnp
from jax.experimental import pallas as pl
from jax.experimental.pallas import tpu as pltpu


_NC = 128      # padded class count (K of first matmul), MXU/lane aligned
_OP = 128      # lane-dense padded output width (true logit count = 10)
_DEAD = 64     # class whose table row is zero -> masks prev-token at t == 0


def _fused_kernel(ids_ref, t_ref, b1_ref, w2_ref, b2_ref, o_ref):
    # ids_ref: (tm, 8) int32  cols 0..3 = pre-offset class ids, rest padding
    # t_ref:   (128, 2d) f32  folded emb @ W1.T tables (rows >= 40 are zero)
    # b1_ref:  (1, 2d)        w2_ref: (2d, 128)       b2_ref: (1, 128)
    # o_ref:   (tm, 128) f32  lane-dense padded logits
    tm = ids_ref.shape[0]
    nc = t_ref.shape[0]

    ids = ids_ref[...]
    classes = jax.lax.broadcasted_iota(jnp.int32, (tm, nc), 1)
    # Class ranges are disjoint (0..9 | 10..19 | 20..29 | 30..39 | dead >= 40),
    # so OR-ing the four one-hot masks gives the exact multi-hot selector.
    hot = ((classes == ids[:, 0:1]) | (classes == ids[:, 1:2])
           | (classes == ids[:, 2:3]) | (classes == ids[:, 3:4])
           ).astype(jnp.float32)

    # h = relu([x, y, x_prev, y_prev] @ W1.T + b1) == relu(hot @ T_cat + b1)
    h = jnp.dot(hot, t_ref[...], preferred_element_type=jnp.float32)
    h = jnp.maximum(h + b1_ref[...], 0.0)          # small f32 VPU epilogue
    o = jnp.dot(h, w2_ref[...], preferred_element_type=jnp.float32)
    o_ref[...] = (o + b2_ref[...]).astype(o_ref.dtype)


@functools.partial(jax.jit, static_argnames=("tm",))
def _fused_pallas(ids, t_pad, b1, w2_pad, b2_pad, *, tm):
    # ids: (M_pad, 8) int32 with M_pad % tm == 0
    M = ids.shape[0]
    NC, H = t_pad.shape
    OP = w2_pad.shape[1]
    grid = (M // tm,)
    return pl.pallas_call(
        _fused_kernel,
        out_shape=jax.ShapeDtypeStruct((M, OP), jnp.float32),
        grid_spec=pltpu.PrefetchScalarGridSpec(
            num_scalar_prefetch=0,
            grid=grid,
            in_specs=[
                pl.BlockSpec((tm, 8), lambda i: (i, 0)),    # ids stream
                pl.BlockSpec((NC, H), lambda i: (0, 0)),    # folded emb@W1.T
                pl.BlockSpec((1, H), lambda i: (0, 0)),     # b1
                pl.BlockSpec((H, OP), lambda i: (0, 0)),    # W2 (padded)
                pl.BlockSpec((1, OP), lambda i: (0, 0)),    # b2 (padded)
            ],
            out_specs=pl.BlockSpec((tm, OP), lambda i: (i, 0)),
        ),
        compiler_params=pltpu.CompilerParams(
            dimension_semantics=("parallel",)),   # megacore split on v7x
    )(ids, t_pad, b1, w2_pad, b2_pad)


def init_params(key, d=32):
    k_emb, k_w1, k_b1, k_w2, k_b2 = jax.random.split(key, 5)
    emb = jax.random.normal(k_emb, (10, d), jnp.float32) * 0.1
    # nn.Linear stores weight as (out, in); keep that convention here.
    w1 = jax.random.normal(k_w1, (2 * d, 4 * d), jnp.float32) * 0.05
    b1 = jax.random.normal(k_b1, (2 * d,), jnp.float32) * 0.05
    w2 = jax.random.normal(k_w2, (10, 2 * d), jnp.float32) * 0.05
    b2 = jax.random.normal(k_b2, (10,), jnp.float32) * 0.05
    return dict(emb=emb, w1=w1, b1=b1, w2=w2, b2=b2)


def _round_up(x, m):
    return (x + m - 1) // m * m


def my_adv_rnn_forward(params, num1, num2, *, d=32, tm=512):
    """Matches myAdvPTRNNModel.forward semantics. Returns (bs, n, 10) f32."""
    emb = params["emb"]                              # (10, d)
    w1_t = params["w1"].T                            # (4d, 2d)
    # Fold the embedding + ln1 matmul into four (10, 2d) lookup tables:
    #   ln1([x, y, xp, yp]) = T1[n1] + T2[n2] + T3[p1] + T4[p2] + b1
    tabs = [emb @ w1_t[k * d:(k + 1) * d] for k in range(4)]
    t_cat = jnp.concatenate(tabs, axis=0)            # (40, 2d)
    t_pad = jnp.zeros((_NC, 2 * d), jnp.float32).at[:40, :].set(t_cat)

    w2_t = params["w2"].T                            # (2d, 10)
    O = w2_t.shape[1]
    w2_pad = jnp.zeros((2 * d, _OP), jnp.float32).at[:, :O].set(w2_t)
    b2_pad = jnp.zeros((1, _OP), jnp.float32).at[:, :O].set(
        params["b2"].reshape(1, -1))

    bs, n = num1.shape
    n1 = num1.astype(jnp.int32)
    n2 = num2.astype(jnp.int32)
    # Previous-token classes, remapped to the DEAD (zero-row) class at t == 0
    # so no masking is needed inside the kernel.
    dead = jnp.full((bs, 1), _DEAD, jnp.int32)
    p1 = jnp.concatenate([dead, n1[:, :-1] + 20], axis=1)
    p2 = jnp.concatenate([dead, n2[:, :-1] + 30], axis=1)

    M = bs * n
    zflat = jnp.zeros((M,), jnp.int32)
    ids = jnp.stack(
        [n1.reshape(-1), (n2 + 10).reshape(-1),
         p1.reshape(-1), p2.reshape(-1),
         zflat, zflat, zflat, zflat], axis=1)        # (M, 8) int32

    # Adaptive row tile: small inputs use one short grid step; large inputs
    # keep tm=512 to amortize per-step overhead.
    tm_eff = min(tm, _round_up(M, 8))
    M_pad = _round_up(M, tm_eff)
    if M_pad != M:
        ids = jnp.pad(ids, ((0, M_pad - M), (0, 0)))

    out = _fused_pallas(ids, t_pad, params["b1"].reshape(1, -1),
                        w2_pad, b2_pad, tm=tm_eff)
    return out[:M, :O].reshape(bs, n, O)


def _reference(params, num1, num2, d=32):
    emb = params["emb"]
    x = jnp.take(emb, num1, axis=0)
    y = jnp.take(emb, num2, axis=0)
    bs, n, _ = x.shape
    r = jnp.concatenate([x, y], axis=-1)
    q = jnp.concatenate(
        [jnp.zeros((bs, 1, 2 * d), r.dtype), r[:, :-1, :]], axis=1)
    r = jnp.concatenate([r, q], axis=-1)
    h = jnp.maximum(r @ params["w1"].T + params["b1"], 0.0)
    return h @ params["w2"].T + params["b2"]


if __name__ == "__main__":
    d = 32
    key = jax.random.PRNGKey(0)
    k_p, k_1, k_2 = jax.random.split(key, 3)
    params = init_params(k_p, d=d)

    # Small shape matching the module's intended use.
    bs, n = 2, 8
    num1 = jax.random.randint(k_1, (bs, n), 0, 10, dtype=jnp.int32)
    num2 = jax.random.randint(k_2, (bs, n), 0, 10, dtype=jnp.int32)
    out = jax.block_until_ready(my_adv_rnn_forward(params, num1, num2, d=d))
    ref = _reference(params, num1, num2, d=d)
    assert out.shape == (bs, n, 10)
    assert jnp.allclose(out, ref, atol=1e-4, rtol=1e-4), \
        float(jnp.max(jnp.abs(out - ref)))

    # Second shape exercising multiple grid steps and row padding.
    bs2, n2 = 4, 160
    num1b = jax.random.randint(jax.random.PRNGKey(1), (bs2, n2), 0, 10,
                               dtype=jnp.int32)
    num2b = jax.random.randint(jax.random.PRNGKey(2), (bs2, n2), 0, 10,
                               dtype=jnp.int32)
    out2 = jax.block_until_ready(my_adv_rnn_forward(params, num1b, num2b, d=d))
    ref2 = _reference(params, num1b, num2b, d=d)
    assert out2.shape == (bs2, n2, 10)
    assert jnp.allclose(out2, ref2, atol=1e-4, rtol=1e-4), \
        float(jnp.max(jnp.abs(out2 - ref2)))

    print("KERNEL_OK")
</pallas_src>

<mosaic_0001>
module attributes {stable_mosaic.version = 11 : i64} {
  func.func @_fused_kernel(%arg0: i32, %arg1: memref<16x8xi32, #tpu.memory_space<vmem>>, %arg2: memref<128x64xf32, #tpu.memory_space<vmem>>, %arg3: memref<1x64xf32, #tpu.memory_space<vmem>>, %arg4: memref<64x128xf32, #tpu.memory_space<vmem>>, %arg5: memref<1x128xf32, #tpu.memory_space<vmem>>, %arg6: memref<16x128xf32, #tpu.memory_space<vmem>>) attributes {dimension_semantics = [#tpu.dimension_semantics<parallel>], iteration_bounds = array<i64: 1>, scalar_prefetch = 0 : i64, scratch_operands = 0 : i64, tpu.core_type = #tpu.core_type<tc>, window_params = [{transform_indices = @transform_0, window_bounds = array<i64: 16, 8>}, {pipeline_mode = #tpu.pipeline_mode<synchronous>, transform_indices = @transform_1, window_bounds = array<i64: 128, 64>}, {pipeline_mode = #tpu.pipeline_mode<synchronous>, transform_indices = @transform_2, window_bounds = array<i64: 1, 64>}, {pipeline_mode = #tpu.pipeline_mode<synchronous>, transform_indices = @transform_3, window_bounds = array<i64: 64, 128>}, {pipeline_mode = #tpu.pipeline_mode<synchronous>, transform_indices = @transform_4, window_bounds = array<i64: 1, 128>}, {transform_indices = @transform_5, window_bounds = array<i64: 16, 128>}]} {
    %c0 = arith.constant 0 : index
    %c0_0 = arith.constant 0 : index
    %0 = vector.load %arg1[%c0, %c0_0] : memref<16x8xi32, #tpu.memory_space<vmem>>, vector<16x8xi32>
    %1 = tpu.iota {dimensions = array<i32: 1>} : vector<16x128xi32>
    %2 = vector.extract_strided_slice %0 {offsets = [0, 0], sizes = [16, 1], strides = [1, 1]} : vector<16x8xi32> to vector<16x1xi32>
    %3 = vector.broadcast %2 : vector<16x1xi32> to vector<16x128xi32>
    %4 = arith.cmpi eq, %1, %3 : vector<16x128xi32>
    %5 = vector.extract_strided_slice %0 {offsets = [0, 1], sizes = [16, 1], strides = [1, 1]} : vector<16x8xi32> to vector<16x1xi32>
    %6 = vector.broadcast %5 : vector<16x1xi32> to vector<16x128xi32>
    %7 = arith.cmpi eq, %1, %6 : vector<16x128xi32>
    %8 = arith.ori %4, %7 : vector<16x128xi1>
    %9 = vector.extract_strided_slice %0 {offsets = [0, 2], sizes = [16, 1], strides = [1, 1]} : vector<16x8xi32> to vector<16x1xi32>
    %10 = vector.broadcast %9 : vector<16x1xi32> to vector<16x128xi32>
    %11 = arith.cmpi eq, %1, %10 : vector<16x128xi32>
    %12 = arith.ori %8, %11 : vector<16x128xi1>
    %13 = vector.extract_strided_slice %0 {offsets = [0, 3], sizes = [16, 1], strides = [1, 1]} : vector<16x8xi32> to vector<16x1xi32>
    %14 = vector.broadcast %13 : vector<16x1xi32> to vector<16x128xi32>
    %15 = arith.cmpi eq, %1, %14 : vector<16x128xi32>
    %16 = arith.ori %12, %15 : vector<16x128xi1>
    %17 = arith.extui %16 : vector<16x128xi1> to vector<16x128xi32>
    %18 = arith.sitofp %17 : vector<16x128xi32> to vector<16x128xf32>
    %c0_1 = arith.constant 0 : index
    %c0_2 = arith.constant 0 : index
    %19 = vector.load %arg2[%c0_1, %c0_2] : memref<128x64xf32, #tpu.memory_space<vmem>>, vector<128x64xf32>
    %cst = arith.constant dense<0.000000e+00> : vector<16x64xf32>
    %20 = tpu.matmul %18, %19, %cst {dimension_numbers = #tpu.dot_dimension_numbers<[1], [0], [0], [1], [0, 0, 1, 1], [], []>} : vector<16x128xf32>, vector<128x64xf32>, vector<16x64xf32> -> vector<16x64xf32>
    %c0_3 = arith.constant 0 : index
    %c0_4 = arith.constant 0 : index
    %21 = vector.load %arg3[%c0_3, %c0_4] : memref<1x64xf32, #tpu.memory_space<vmem>>, vector<1x64xf32>
    %22 = vector.broadcast %21 : vector<1x64xf32> to vector<16x64xf32>
    %23 = arith.addf %20, %22 : vector<16x64xf32>
    %cst_5 = arith.constant 0.000000e+00 : f32
    %24 = vector.broadcast %cst_5 : f32 to vector<16x64xf32>
    %25 = arith.maximumf %23, %24 : vector<16x64xf32>
    %c0_6 = arith.constant 0 : index
    %c0_7 = arith.constant 0 : index
    %26 = vector.load %arg4[%c0_6, %c0_7] : memref<64x128xf32, #tpu.memory_space<vmem>>, vector<64x128xf32>
    %cst_8 = arith.constant dense<0.000000e+00> : vector<16x128xf32>
    %27 = tpu.matmul %25, %26, %cst_8 {dimension_numbers = #tpu.dot_dimension_numbers<[1], [0], [0], [1], [0, 0, 1, 1], [], []>} : vector<16x64xf32>, vector<64x128xf32>, vector<16x128xf32> -> vector<16x128xf32>
    %c0_9 = arith.constant 0 : index
    %c0_10 = arith.constant 0 : index
    %28 = vector.load %arg5[%c0_9, %c0_10] : memref<1x128xf32, #tpu.memory_space<vmem>>, vector<1x128xf32>
    %29 = vector.broadcast %28 : vector<1x128xf32> to vector<16x128xf32>
    %30 = arith.addf %27, %29 : vector<16x128xf32>
    %c0_11 = arith.constant 0 : index
    %c0_12 = arith.constant 0 : index
    %31 = vector.load %arg6[%c0_11, %c0_12] : memref<16x128xf32, #tpu.memory_space<vmem>>, vector<16x128xf32>
    tpu.vector_store %arg6[%c0_11, %c0_12], %30 {strides = array<i32>} : memref<16x128xf32, #tpu.memory_space<vmem>>, vector<16x128xf32>,
    return
  }
  func.func @transform_0(%arg0: i32) -> (i32, i32) {
    %c0_i32 = arith.constant 0 : i32
    %c0_i32_0 = arith.constant 0 : i32
    return %arg0, %c0_i32 : i32, i32
  }
  func.func @transform_1(%arg0: i32) -> (i32, i32) {
    %c0_i32 = arith.constant 0 : i32
    %c0_i32_0 = arith.constant 0 : i32
    %c0_i32_1 = arith.constant 0 : i32
    return %c0_i32, %c0_i32_0 : i32, i32
  }
  func.func @transform_2(%arg0: i32) -> (i32, i32) {
    %c0_i32 = arith.constant 0 : i32
    %c0_i32_0 = arith.constant 0 : i32
    %c0_i32_1 = arith.constant 0 : i32
    return %c0_i32, %c0_i32_0 : i32, i32
  }
  func.func @transform_3(%arg0: i32) -> (i32, i32) {
    %c0_i32 = arith.constant 0 : i32
    %c0_i32_0 = arith.constant 0 : i32
    %c0_i32_1 = arith.constant 0 : i32
    return %c0_i32, %c0_i32_0 : i32, i32
  }
  func.func @transform_4(%arg0: i32) -> (i32, i32) {
    %c0_i32 = arith.constant 0 : i32
    %c0_i32_0 = arith.constant 0 : i32
    %c0_i32_1 = arith.constant 0 : i32
    return %c0_i32, %c0_i32_0 : i32, i32
  }
  func.func @transform_5(%arg0: i32) -> (i32, i32) {
    %c0_i32 = arith.constant 0 : i32
    %c0_i32_0 = arith.constant 0 : i32
    return %arg0, %c0_i32 : i32, i32
  }
}

</mosaic_0001>

<bundles_post_ra>
// kernel: _fused_pallas.1
= control target key start
LH: loop header
LB: loop body
LE: loop exit
PB: predicated region body
PF: predicated region fallthrough
CT: control target
= control target key end

     0   :  { %v460_v2 = vmov 0   ;;  %s594_s0 = inlined_call_operand.vmem [shape: s32[16,8], index: 0, kind: input, shape index: {}]   ;;  %s595_s1 = inlined_call_operand.vmem [shape: f32[128,64], index: 1, kind: input, shape index: {}]   ;;  %s596_s2 = inlined_call_operand.vmem [shape: f32[1,64], index: 2, kind: input, shape index: {}]   ;;  %s597_s3 = inlined_call_operand.vmem [shape: f32[64,128], index: 3, kind: input, shape index: {}]   ;;  %s598_s4 = inlined_call_operand.vmem [shape: f32[1,128], index: 4, kind: input, shape index: {}]   ;;  %s599_s5 = inlined_call_operand.hbm [shape: f32[16,128], index: 5, kind: output, shape index: {}]  }
   0x1   :  { %v22_v0 = vld [vmem:[%s594_s0 + $0x8] sm:$0xff]  ;;  %v21_v1 = vld [vmem:[%s594_s0] sm:$0xff]  ;;  %430 = vset.pattern.permute.xlu1 %v460_v2  ;;  %428 = vset.pattern.permute.xlu0 %v460_v2  ;;  %v69_v5 = vld [vmem:[%s595_s1 + $0x10] sm:$0xff] }
   0x2   :  { %v67_v3 = vld [vmem:[%s595_s1] sm:$0xff]  ;;  %v68_v4 = vld [vmem:[%s595_s1 + $0x8] sm:$0xff]  ;;  %29 = vperm.xlu1 %430, %v22_v0   ;;  %26 = vperm.xlu0 %428, %v21_v1   ;;  %v70_v7 = vld [vmem:[%s595_s1 + $0x18] sm:$0xff] }
   0x3   :  { %v372_v6 = vpack.c.bf16 %v68_v4, %v67_v3  ;;  %v71_v8 = vld [vmem:[%s595_s1 + $0x20] sm:$0xff]  ;;  %v72_v9 = vld [vmem:[%s595_s1 + $0x28] sm:$0xff] }
   0x4   :  { %10 = vsyncpa [#allocation3], 0  ;;  %v376_v10 = vpack.c.bf16 %v70_v7, %v69_v5  ;;  %v461_v11 = vmov 1   ;;  %v380_v12 = vpack.c.bf16 %v72_v9, %v71_v8  ;;  %v73_v13 = vld [vmem:[%s595_s1 + $0x30] sm:$0xff]  ;;  %v74_v14 = vld [vmem:[%s595_s1 + $0x38] sm:$0xff]  ;;  %v462_v16 = vmov 2  }
   0x5   :  { %373 = vmatprep.subr.bf16.mxu0 %v372_v6  ;;  %v384_v15 = vpack.c.bf16 %v74_v14, %v73_v13  ;;  %v75_v17 = vld [vmem:[%s595_s1 + $0x40] sm:$0xff]  ;;  %v76_v18 = vld [vmem:[%s595_s1 + $0x48] sm:$0xff]  ;;  %v77_v20 = vld [vmem:[%s595_s1 + $0x50] sm:$0xff]  ;;  %v463_v22 = vmov 3   ;;  %v23_v41 = vlaneseq  ;;  %v464_v48 = vmov 1.0  }
   0x6   :  { %375 = vmatpush3.bf16.msra.mxu0 %v372_v6  ;;  %431 = vset.pattern.permute.xlu1 %v461_v11  ;;  %v388_v19 = vpack.c.bf16 %v76_v18, %v75_v17  ;;  %v78_v21 = vld [vmem:[%s595_s1 + $0x58] sm:$0xff]  ;;  %v79_v24 = vld [vmem:[%s595_s1 + $0x60] sm:$0xff]  ;;  %v80_v25 = vld [vmem:[%s595_s1 + $0x68] sm:$0xff]  ;;  %vm182_vm14 = vcmask 523264  }
   0x7   :  { %429 = vset.pattern.permute.xlu0 %v461_v11  ;;  %37 = vperm.xlu1 %431, %v22_v0   ;;  %v392_v23 = vpack.c.bf16 %v78_v21, %v77_v20  ;;  %v396_v26 = vpack.c.bf16 %v80_v25, %v79_v24  ;;  %v81_v27 = vld [vmem:[%s595_s1 + $0x70] sm:$0xff]  ;;  %v82_v28 = vld [vmem:[%s595_s1 + $0x78] sm:$0xff]  ;;  %v167_v29 = vld [vmem:[%s597_s3] sm:$0xff]  ;;  %v24_v43 = vand.u32 127, %v23_v41 }
   0x8   :  { %34 = vperm.xlu0 %429, %v21_v1   ;;  %377 = vmatprep.subr.bf16.mxu0 %v376_v10  ;;  %v168_v30 = vld [vmem:[%s597_s3 + $0x8] sm:$0xff]  ;;  %v169_v31 = vld [vmem:[%s597_s3 + $0x10] sm:$0xff]  ;;  %v170_v33 = vld [vmem:[%s597_s3 + $0x18] sm:$0xff]  ;;  %v400_v37 = vpack.c.bf16 %v82_v28, %v81_v27 }
   0x9   :  { %v404_v32 = vpack.c.bf16 %v168_v30, %v167_v29  ;;  %v408_v34 = vpack.c.bf16 %v170_v33, %v169_v31  ;;  %v171_v35 = vld [vmem:[%s597_s3 + $0x20] sm:$0xff]  ;;  %v172_v36 = vld [vmem:[%s597_s3 + $0x28] sm:$0xff]  ;;  %v173_v50 = vld [vmem:[%s597_s3 + $0x30] sm:$0xff] }
   0xa   :  { %379 = vmatpush3.bf16.msra.mxu0 %v376_v10  ;;  %v412_v38 = vpack.c.bf16 %v172_v36, %v171_v35  ;;  %v174_v51 = vld [vmem:[%s597_s3 + $0x38] sm:$0xff]  ;;  %v284_v53 = vld [vmem:[%s596_s2] ss:$0 sm:$0xff]  ;;  %s465_s3 = smov [#allocation2]  }
   0xb   :  { %381 = vmatprep.subr.bf16.mxu0 %v380_v12  ;;  %432 = vset.pattern.permute.xlu1 %v462_v16  ;;  %v416_v52 = vpack.c.bf16 %v174_v51, %v173_v50  ;;  %v287_v60 = vld [vmem:[%s598_s4] ss:$0 sm:$0xff]  ;;  %s271_s21 = sshll.u32 %s465_s3, 4  ;;  %s272_s21 = int_to_ptr.vmem [resolvable:$true] %s271_s21 }
   0xc   :  { %433 = vset.pattern.permute.xlu0 %v462_v16  ;;  %44 = vperm.xlu1 %432, %v21_v1   ;;  %s436_s2 = scalar_lea.vmem %s272_s21, 256  ;;  %p441_p1 = scmp.lt.s32.totalorder %s272_s21, %s272_s21 }
   0xd   :  { %47 = vperm.xlu0 %433, %v22_v0   ;;  %405 = vmatprep.subr.bf16.mxu1 %v404_v32  ;;  %p437_p0 = scmp.ne.s32.totalorder %s272_s21, %s436_s2  ;;  %p442_p2 = scmp.lt.s32.totalorder %s436_s2, %s436_s2 }
   0xe   :  { %383 = vmatpush3.bf16.msra.mxu0 %v380_v12  ;;  %407 = vmatpush3.bf16.msra.mxu1 %v404_v32 }
   0xf   :  { %385 = vmatprep.subr.bf16.mxu0 %v384_v15  ;;  %409 = vmatprep.subr.bf16.mxu1 %v408_v34  ;;  %p443_p3 = por %p442_p2, %p441_p1 }
  0x10   :  { %434 = vset.pattern.permute.xlu1 %v463_v22 }
  0x11   :  { %435 = vset.pattern.permute.xlu0 %v463_v22  ;;  %54 = vperm.xlu1 %434, %v21_v1   ;;  %p444_p4 = pnand %p443_p3, %p437_p0 }
  0x12   :  { %387 = vmatpush3.bf16.msra.mxu0 %v384_v15  ;;  %411 = vmatpush3.bf16.msra.mxu1 %v408_v34 }
  0x13   :  { %389 = vmatprep.subr.bf16.mxu0 %v388_v19  ;;  %413 = vmatprep.subr.bf16.mxu1 %v412_v38 }
  0x15   :  { %57 = vperm.xlu1 %434, %v22_v0  }
  0x16   :  { %391 = vmatpush3.bf16.msra.mxu0 %v388_v19  ;;  %415 = vmatpush3.bf16.msra.mxu1 %v412_v38 }
  0x17   :  { %393 = vmatprep.subr.bf16.mxu0 %v392_v23  ;;  %417 = vmatprep.subr.bf16.mxu1 %v416_v52 }
  0x1a   :  { %395 = vmatpush3.bf16.msra.mxu0 %v392_v23  ;;  %419 = vmatpush3.bf16.msra.mxu1 %v416_v52 }
  0x1b   :  { %397 = vmatprep.subr.bf16.mxu0 %v396_v26 }
  0x1e   :  { %399 = vmatpush3.bf16.msra.mxu0 %v396_v26 }
  0x1f   :  { %401 = vmatprep.subr.bf16.mxu0 %v400_v37 }
  0x22   :  { %403 = vmatpush3.bf16.msra.mxu0 %v400_v37 }
  0x81   :  { %v30_v39 = vpop.permute.xlu1 %29  ;;  %v27_v40 = vpop.permute.xlu0 %26 }
  0x82   :  { %vm31_vm0 = vcmp.eq.s32.totalorder %v24_v43, %v27_v40  ;;  %vm32_vm9 = vcmp.eq.s32.totalorder %v24_v43, %v30_v39 }
  0x86   :  { %v38_v42 = vpop.permute.xlu1 %37 }
  0x87   :  { %v35_v44 = vpop.permute.xlu0 %34  ;;  %vm40_vm4 = vcmp.eq.s32.totalorder %v24_v43, %v38_v42 }
  0x88   :  { %vm39_vm1 = vcmp.eq.s32.totalorder %v24_v43, %v35_v44  ;;  %vm42_vm10 = vmor %vm32_vm9, %vm40_vm4 }
  0x89   :  { %vm41_vm2 = vmor %vm31_vm0, %vm39_vm1 }
  0x8b   :  { %v45_v45 = vpop.permute.xlu1 %44 }
  0x8c   :  { %vm49_vm3 = vcmp.eq.s32.totalorder %v24_v43, %v45_v45  ;;  %v48_v46 = vpop.permute.xlu0 %47 }
  0x8d   :  { %vm51_vm6 = vmor %vm41_vm2, %vm49_vm3  ;;  %vm50_vm7 = vcmp.eq.s32.totalorder %v24_v43, %v48_v46 }
  0x8e   :  { %vm52_vm11 = vmor %vm42_vm10, %vm50_vm7 }
  0x90   :  { %v55_v47 = vpop.permute.xlu1 %54 }
  0x91   :  { %vm59_vm5 = vcmp.eq.s32.totalorder %v24_v43, %v55_v47 }
  0x92   :  { %vm61_vm8 = vmor %vm51_vm6, %vm59_vm5 }
  0x93   :  { %350 = vmatprep.mubr.msk.f32.mxu0 %vm61_vm8, %v464_v48 }
  0x94   :  { %v58_v49 = vpop.permute.xlu1 %57 }
  0x95   :  { %vm60_vm12 = vcmp.eq.s32.totalorder %v24_v43, %v58_v49 }
  0x96   :  { %vm62_vm13 = vmor %vm52_vm11, %vm60_vm12 }
  0x97   :  { %351 = vmatmul.mubr.msk.f32.vlgmr.msra.gmra.mrb[0].mxu0 %vm62_vm13, %v464_v48 }
 0x16a   :  { %v352_v54 = vpop.f32.mrb[0].mxu0 }
 0x16b   :  { %v162_v55 = vadd.f32 %v352_v54, %v284_v53  ;;  %v156_v56 = vpop.f32.mrb[1].mxu0 }
 0x16c   :  { %v157_v57 = vadd.f32 %v284_v53, %v156_v56 }
 0x16d   :  { %v166_v59 = vmax.f32 %v162_v55, 0.0 }
 0x16e   :  { %v165_v58 = vmax.f32 %v157_v57, 0.0 }
 0x170   :  { %369 = vmatprep.mubr.msk.f32.mxu1 %vm182_vm14, %v165_v58 }
 0x171   :  { %370 = vmatmul.mubr.msk.f32.vlgmr.msra.gmra.mrb[0].mxu1 %vm182_vm14, %v166_v59 }
 0x244   :  { %v371_v61 = vpop.f32.mrb[0].mxu1 }
 0x245   :  { %v261_v62 = vadd.f32 %v371_v61, %v287_v60  ;;  %v255_v63 = vpop.f32.mrb[1].mxu1 }
 0x246   :  { %v256_v0 = vadd.f32 %v287_v60, %v255_v63 }
 0x247   :  { %265 = vst [vmem:[#allocation2 + $0x8] sm:$0xff] %v261_v62 }
 0x248   :  { %264 = vst [vmem:[#allocation2] sm:$0xff] %v256_v0 }
 0x249   :  { %447 = shalt.err (!%p444_p4)
}
 0x24a   :  { %s448_s4 = scalar_lea.hbm %s599_s5, 256 }
 0x24b   :  { %p449_p5 = scmp.ne.s32.totalorder %s599_s5, %s448_s4  ;;  %p452_p6 = scmp.lt.u32.totalorder %s448_s4, %s599_s5 }
 0x24d   :  { %p454_p7 = pnand %p452_p6, %p449_p5 }
 0x24f   :  { %457 = shalt.err (!%p454_p7)
}
 0x250   :  { %s466_s28 = smov 128   ;;  %s467_s0 = smov 8  }
 0x251   :  { %277 = dma.vmem_to_hbm [thread:$0]  %s272_s21, 256, %s599_s5, [#allocation3], %s466_s28, %s466_s28, %s467_s0  }
 0x252   :  { %458 = dma.done.wait [#allocation3], 256  }
 0x253   :  { %459 = vsyncadd [#allocation3], 4294967040 }
 0x254   :  { %281 = vsyncpa [#allocation3], 1 }

</bundles_post_ra>
